<compile_context>
chip_gen: v6e
topology: v6e:2x2x1
jax: 0.10.0
libtpu: 0.0.40
codegen_flags: <defaults>
</compile_context>

<pallas_src>
import functools

import jax
import jax.numpy as jnp
from jax.experimental import pallas as pl
from jax.experimental.pallas import tpu as pltpu


def _round_up(x, m):
    return ((x + m - 1) // m) * m


_MIN_SPLIT_ROWS = 4096  # below this, a second grid step is pure overhead on any chip


def _pick_batch_tile(batch, batch_tile):
    """Choose the batch tile (lane dimension of every matmul inside the kernel)."""
    if batch < _MIN_SPLIT_ROWS:
        # Single fused grid step; tile == batch is always a legal block shape.
        return batch
    # Large batch: lane-aligned tiles, and keep >= 2 steps so both TensorCores on v7x
    # get work (each step stays >= ~2048 rows, so the 0.35us/step tax is negligible).
    tile = min(batch_tile, _round_up(pl.cdiv(batch, 2), 128))
    return max(tile, 128)


def _mlp_kernel(layer_dims, compute_dtype, x_ref, w_ref, b_ref, o_ref):
    """Fused MLP body.

    layer_dims : static tuple of (in_i, out_i) per layer; last entry is the output head.
    x_ref      : (tile, in0)            f32      -- cast to compute_dtype in-kernel
    w_ref      : (L, max_out, max_in)   compute  -- packed, row li = layer li's (out, in) W
    b_ref      : (max_out, L)           f32      -- packed, column li = layer li's bias
    o_ref      : (out_last, tile)       f32      -- lane-dense output slab
    """
    n_layers = len(layer_dims)
    b_all = b_ref[...]                                       # tiny, load once

    # Layer 0: contract x's feature axis against W0's feature axis so the result comes
    # out already oriented (out0, tile) -- batch on the MXU lane/N dimension.
    in0, out0 = layer_dims[0]
    x = x_ref[...].astype(compute_dtype)                     # in-kernel cast (VPU slack)
    w0 = w_ref[0][:out0, :in0]                               # (out0, in0)
    h = jnp.einsum("oi,bi->ob", w0, x,
                   preferred_element_type=jnp.float32)       # (out0, tile) f32 acc
    h = h + b_all[:out0, 0:1]
    if n_layers > 1:
        h = jnp.maximum(h, 0.0).astype(compute_dtype)        # ReLU in f32, cast for MXU

    # Remaining layers: plain (out_i, in_i) @ (in_i, tile) matmuls.
    for li in range(1, n_layers):
        in_i, out_i = layer_dims[li]
        w = w_ref[li][:out_i, :in_i]                         # (out_i, in_i)
        h = jnp.dot(w, h, preferred_element_type=jnp.float32) + b_all[:out_i, li:li + 1]
        if li < n_layers - 1:                                # no activation on the head
            h = jnp.maximum(h, 0.0).astype(compute_dtype)

    o_ref[...] = h.astype(o_ref.dtype)                       # (out_last, tile)


def deep_scorer_pallas(x, params, *, batch_tile=4096, compute_dtype=jnp.bfloat16):
    """Run the DeepScorer MLP as one fused Pallas kernel.

    x       : (B, input_size) float32
    params  : list of (W, b) pairs in torch.nn.Linear layout: W (out, in), b (out,).
              Last pair is the output layer with out == 1.
    Returns : (B, 1) float32.
    compute_dtype=jnp.float32 reproduces the torch module's f32 math exactly;
    the default bf16 keeps the MXU at full rate (f32 accumulation, f32 bias/ReLU).
    """
    B, in_dim = x.shape
    n_layers = len(params)
    layer_dims = tuple((w.shape[1], w.shape[0]) for w, _ in params)   # (in_i, out_i)
    out_dim = layer_dims[-1][1]                                       # == 1 for DeepScorer
    assert layer_dims[0][0] == in_dim

    max_out = max(o for _, o in layer_dims)
    max_in = max(i for i, _ in layer_dims)

    # Pack the (tiny) parameters into two buffers.  In a real deployment do this once
    # outside the hot path; here it costs only a few KB of HBM traffic per call.
    w_pack = jnp.zeros((n_layers, max_out, max_in), dtype=compute_dtype)
    b_pack = jnp.zeros((max_out, n_layers), dtype=jnp.float32)
    for li, (w, b) in enumerate(params):
        fo, fi = w.shape
        w_pack = w_pack.at[li, :fo, :fi].set(w.astype(compute_dtype))
        b_pack = b_pack.at[:fo, li].set(jnp.reshape(b, (-1,)).astype(jnp.float32))

    tile = _pick_batch_tile(B, _round_up(max(int(batch_tile), 128), 128))
    grid = (pl.cdiv(B, tile),)

    in_specs = [
        pl.BlockSpec((tile, in_dim), lambda i: (i, 0)),       # x: f32, tiled on batch only
        pl.BlockSpec(w_pack.shape, lambda i: (0, 0, 0)),      # packed weights (grid-invariant)
        pl.BlockSpec(b_pack.shape, lambda i: (0, 0)),         # packed biases  (grid-invariant)
    ]
    out_specs = pl.BlockSpec((out_dim, tile), lambda i: (0, i))   # lane-dense output slab

    # Advisory cost estimate (x is read in f32 now; cast happens in-kernel).
    sizes = [in_dim] + [o for _, o in layer_dims]
    flops = sum(2 * B * fi * fo for fi, fo in zip(sizes[:-1], sizes[1:]))
    bytes_accessed = (x.size * x.dtype.itemsize
                      + B * out_dim * x.dtype.itemsize
                      + w_pack.size * w_pack.dtype.itemsize
                      + b_pack.size * b_pack.dtype.itemsize)
    cost = pl.CostEstimate(flops=flops, transcendentals=0, bytes_accessed=bytes_accessed)

    kernel = functools.partial(_mlp_kernel, layer_dims, compute_dtype)

    out = pl.pallas_call(
        kernel,
        out_shape=jax.ShapeDtypeStruct((out_dim, B), x.dtype),
        grid_spec=pltpu.PrefetchScalarGridSpec(
            num_scalar_prefetch=0,
            grid=grid,
            in_specs=in_specs,
            out_specs=out_specs,
        ),
        compiler_params=pltpu.CompilerParams(dimension_semantics=("parallel",)),
        cost_estimate=cost,
    )(x, w_pack, b_pack)

    # (out_dim, B) -> (B, out_dim); out_dim == 1 so this is effectively a free reshape.
    return out.T


def init_deep_scorer_params(key, input_size, layers):
    """Deterministic init matching torch.nn.Linear: W (out, in), b (out,),
    uniform(-1/sqrt(fan_in), 1/sqrt(fan_in)).  Last layer has out == 1."""
    sizes = [input_size] + list(layers) + [1]
    params = []
    for fan_in, fan_out in zip(sizes[:-1], sizes[1:]):
        key, kw, kb = jax.random.split(key, 3)
        bound = 1.0 / jnp.sqrt(jnp.float32(fan_in))
        w = jax.random.uniform(kw, (fan_out, fan_in), jnp.float32, -bound, bound)
        b = jax.random.uniform(kb, (fan_out,), jnp.float32, -bound, bound)
        params.append((w, b))
    return params


def deep_scorer_ref(x, params, compute_dtype=jnp.float32):
    """Pure-JAX reference (optionally with the same bf16 rounding as the kernel)."""
    h = x.astype(compute_dtype)
    for li, (w, b) in enumerate(params):
        a = jnp.einsum("bi,oi->bo", h, w.astype(compute_dtype),
                       preferred_element_type=jnp.float32,
                       precision=jax.lax.Precision.HIGHEST) + b.astype(jnp.float32)
        h = jnp.maximum(a, 0.0).astype(compute_dtype) if li < len(params) - 1 else a
    return h


if __name__ == "__main__":
    key = jax.random.PRNGKey(0)

    # Small shapes consistent with the module: DeepScorer(input_size=32, layers=[64, 32])
    batch = 64
    input_size = 32
    hidden_layers = [64, 32]

    key, kx = jax.random.split(key)
    x = jax.random.normal(kx, (batch, input_size), dtype=jnp.float32)
    params = init_deep_scorer_params(key, input_size, hidden_layers)

    # Default (bf16-matmul) fast path.
    out_bf16 = jax.block_until_ready(deep_scorer_pallas(x, params))
    ref_bf16 = deep_scorer_ref(x, params, compute_dtype=jnp.bfloat16)
    ref_f32 = deep_scorer_ref(x, params, compute_dtype=jnp.float32)
    assert out_bf16.shape == (batch, 1), out_bf16.shape
    assert jnp.allclose(out_bf16, ref_bf16, atol=5e-3, rtol=5e-3), \
        "bf16 path mismatch vs matched reference"
    assert jnp.allclose(out_bf16, ref_f32, atol=5e-2, rtol=5e-2), \
        "bf16 path drifted too far from f32 reference"

    # Exact-semantics f32 path (matches the PyTorch module's math).
    out_f32 = jax.block_until_ready(
        deep_scorer_pallas(x, params, compute_dtype=jnp.float32))
    assert out_f32.shape == (batch, 1), out_f32.shape
    assert jnp.allclose(out_f32, ref_f32, atol=1e-4, rtol=1e-4), \
        "f32 path mismatch vs reference"

    print("KERNEL_OK")
</pallas_src>

<mosaic_0001>
module attributes {stable_mosaic.version = 11 : i64} {
  func.func @_mlp_kernel(%arg0: i32, %arg1: memref<64x32xf32, #tpu.memory_space<vmem>>, %arg2: memref<3x64x64xbf16, #tpu.memory_space<vmem>>, %arg3: memref<64x3xf32, #tpu.memory_space<vmem>>, %arg4: memref<1x64xf32, #tpu.memory_space<vmem>>) attributes {dimension_semantics = [#tpu.dimension_semantics<parallel>], iteration_bounds = array<i64: 1>, scalar_prefetch = 0 : i64, scratch_operands = 0 : i64, tpu.core_type = #tpu.core_type<tc>, window_params = [{transform_indices = @transform_0, window_bounds = array<i64: 64, 32>}, {pipeline_mode = #tpu.pipeline_mode<synchronous>, transform_indices = @transform_1, window_bounds = array<i64: 3, 64, 64>}, {pipeline_mode = #tpu.pipeline_mode<synchronous>, transform_indices = @transform_2, window_bounds = array<i64: 64, 3>}, {transform_indices = @transform_3, window_bounds = array<i64: 1, 64>}]} {
    %c0 = arith.constant 0 : index
    %c0_0 = arith.constant 0 : index
    %0 = vector.load %arg3[%c0, %c0_0] : memref<64x3xf32, #tpu.memory_space<vmem>>, vector<64x3xf32>
    %c0_1 = arith.constant 0 : index
    %c0_2 = arith.constant 0 : index
    %1 = vector.load %arg1[%c0_1, %c0_2] : memref<64x32xf32, #tpu.memory_space<vmem>>, vector<64x32xf32>
    %2 = arith.truncf %1 : vector<64x32xf32> to vector<64x32xbf16>
    %c0_3 = arith.constant 0 : index
    %c0_4 = arith.constant 0 : index
    %c0_5 = arith.constant 0 : index
    %3 = vector.load %arg2[%c0_3, %c0_4, %c0_5] : memref<3x64x64xbf16, #tpu.memory_space<vmem>>, vector<1x64x64xbf16>
    %4 = vector.shape_cast %3 : vector<1x64x64xbf16> to vector<64x64xbf16>
    %5 = vector.extract_strided_slice %4 {offsets = [0, 0], sizes = [64, 32], strides = [1, 1]} : vector<64x64xbf16> to vector<64x32xbf16>
    "tpu.trace_start"() <{level = 10 : i32, message = "oi,bi->ob"}> : () -> ()
    %cst = arith.constant dense<0.000000e+00> : vector<64x64xf32>
    %6 = tpu.matmul %5, %2, %cst {dimension_numbers = #tpu.dot_dimension_numbers<[1], [1], [0], [0], [0, 0, 1, 0], [], []>} : vector<64x32xbf16>, vector<64x32xbf16>, vector<64x64xf32> -> vector<64x64xf32>
    "tpu.trace_stop"() : () -> ()
    %7 = vector.extract_strided_slice %0 {offsets = [0, 0], sizes = [64, 1], strides = [1, 1]} : vector<64x3xf32> to vector<64x1xf32>
    %8 = vector.broadcast %7 : vector<64x1xf32> to vector<64x64xf32>
    %9 = arith.addf %6, %8 : vector<64x64xf32>
    %cst_6 = arith.constant 0.000000e+00 : f32
    %10 = vector.broadcast %cst_6 : f32 to vector<64x64xf32>
    %11 = arith.maximumf %9, %10 : vector<64x64xf32>
    %12 = arith.truncf %11 : vector<64x64xf32> to vector<64x64xbf16>
    %c1 = arith.constant 1 : index
    %c0_7 = arith.constant 0 : index
    %c0_8 = arith.constant 0 : index
    %13 = vector.load %arg2[%c1, %c0_7, %c0_8] : memref<3x64x64xbf16, #tpu.memory_space<vmem>>, vector<1x64x64xbf16>
    %14 = vector.shape_cast %13 : vector<1x64x64xbf16> to vector<64x64xbf16>
    %15 = vector.extract_strided_slice %14 {offsets = [0, 0], sizes = [32, 64], strides = [1, 1]} : vector<64x64xbf16> to vector<32x64xbf16>
    %cst_9 = arith.constant dense<0.000000e+00> : vector<32x64xf32>
    %16 = tpu.matmul %15, %12, %cst_9 {dimension_numbers = #tpu.dot_dimension_numbers<[1], [0], [0], [1], [0, 0, 1, 1], [], []>} : vector<32x64xbf16>, vector<64x64xbf16>, vector<32x64xf32> -> vector<32x64xf32>
    %17 = vector.extract_strided_slice %0 {offsets = [0, 1], sizes = [32, 1], strides = [1, 1]} : vector<64x3xf32> to vector<32x1xf32>
    %18 = vector.broadcast %17 : vector<32x1xf32> to vector<32x64xf32>
    %19 = arith.addf %16, %18 : vector<32x64xf32>
    %cst_10 = arith.constant 0.000000e+00 : f32
    %20 = vector.broadcast %cst_10 : f32 to vector<32x64xf32>
    %21 = arith.maximumf %19, %20 : vector<32x64xf32>
    %22 = arith.truncf %21 : vector<32x64xf32> to vector<32x64xbf16>
    %c2 = arith.constant 2 : index
    %c0_11 = arith.constant 0 : index
    %c0_12 = arith.constant 0 : index
    %23 = vector.load %arg2[%c2, %c0_11, %c0_12] : memref<3x64x64xbf16, #tpu.memory_space<vmem>>, vector<1x64x64xbf16>
    %24 = vector.shape_cast %23 : vector<1x64x64xbf16> to vector<64x64xbf16>
    %25 = vector.extract_strided_slice %24 {offsets = [0, 0], sizes = [1, 32], strides = [1, 1]} : vector<64x64xbf16> to vector<1x32xbf16>
    %cst_13 = arith.constant dense<0.000000e+00> : vector<1x64xf32>
    %26 = tpu.matmul %25, %22, %cst_13 {dimension_numbers = #tpu.dot_dimension_numbers<[1], [0], [0], [1], [0, 0, 1, 1], [], []>} : vector<1x32xbf16>, vector<32x64xbf16>, vector<1x64xf32> -> vector<1x64xf32>
    %27 = vector.extract_strided_slice %0 {offsets = [0, 2], sizes = [1, 1], strides = [1, 1]} : vector<64x3xf32> to vector<1x1xf32>
    %28 = vector.broadcast %27 : vector<1x1xf32> to vector<1x64xf32>
    %29 = arith.addf %26, %28 : vector<1x64xf32>
    %c0_14 = arith.constant 0 : index
    %c0_15 = arith.constant 0 : index
    %30 = vector.load %arg4[%c0_14, %c0_15] : memref<1x64xf32, #tpu.memory_space<vmem>>, vector<1x64xf32>
    tpu.vector_store %arg4[%c0_14, %c0_15], %29 {strides = array<i32>} : memref<1x64xf32, #tpu.memory_space<vmem>>, vector<1x64xf32>,
    return
  }
  func.func @transform_0(%arg0: i32) -> (i32, i32) {
    %c0_i32 = arith.constant 0 : i32
    %c0_i32_0 = arith.constant 0 : i32
    return %arg0, %c0_i32 : i32, i32
  }
  func.func @transform_1(%arg0: i32) -> (i32, i32, i32) {
    %c0_i32 = arith.constant 0 : i32
    %c0_i32_0 = arith.constant 0 : i32
    %c0_i32_1 = arith.constant 0 : i32
    %c0_i32_2 = arith.constant 0 : i32
    return %c0_i32, %c0_i32_0, %c0_i32_1 : i32, i32, i32
  }
  func.func @transform_2(%arg0: i32) -> (i32, i32) {
    %c0_i32 = arith.constant 0 : i32
    %c0_i32_0 = arith.constant 0 : i32
    %c0_i32_1 = arith.constant 0 : i32
    return %c0_i32, %c0_i32_0 : i32, i32
  }
  func.func @transform_3(%arg0: i32) -> (i32, i32) {
    %c0_i32 = arith.constant 0 : i32
    %c0_i32_0 = arith.constant 0 : i32
    return %c0_i32, %arg0 : i32, i32
  }
}

</mosaic_0001>

<bundles_post_ra>
// kernel: tpu_custom_call.1
= control target key start
LH: loop header
LB: loop body
LE: loop exit
PB: predicated region body
PF: predicated region fallthrough
CT: control target
= control target key end

     0   :  { %vm104_vm0 = vcmask 261120   ;;  %v479_v5 = vmov 0   ;;  %s597_s0 = inlined_call_operand.vmem [shape: f32[64,32], index: 0, kind: input, shape index: {}]   ;;  %s598_s1 = inlined_call_operand.vmem [shape: bf16[3,64,64], index: 1, kind: input, shape index: {}]   ;;  %s599_s2 = inlined_call_operand.vmem [shape: f32[64,3], index: 2, kind: input, shape index: {}]   ;;  %s600_s3 = inlined_call_operand.hbm [shape: f32[1,64], index: 3, kind: output, shape index: {}]  }
   0x1   :  { %v30_v0 = vld [vmem:[%s597_s0 + $0x30] sm:$0xff]  ;;  %v31_v1 = vld [vmem:[%s597_s0 + $0x38] sm:$0xff]  ;;  %v28_v2 = vld [vmem:[%s597_s0 + $0x20] sm:$0xff]  ;;  %445 = vset.pattern.permute.xlu0 %v479_v5  ;;  %446 = vset.pattern.permute.xlu1 %v479_v5 }
   0x2   :  { %v35_v3 = vpack.c.bf16 %v31_v1, %v30_v0  ;;  %v29_v4 = vld [vmem:[%s597_s0 + $0x28] sm:$0xff]  ;;  %v451_v8 = vld [vmem:[%s598_s1] sm:$0xff]   ;;  %v26_v9 = vld [vmem:[%s597_s0 + $0x10] sm:$0xff] }
   0x3   :  { %v34_v6 = vpack.c.bf16 %v29_v4, %v28_v2  ;;  %v27_v10 = vld [vmem:[%s597_s0 + $0x18] sm:$0xff]  ;;  %407 = vmatprep.mubr.msk.bf16.mxu0 %vm104_vm0, %v451_v8  ;;  %v22_v11 = vld [vmem:[%s599_s2 + $0x30] sm:$0xff]  ;;  %v20_v12 = vld [vmem:[%s599_s2 + $0x20] sm:$0xff] }
   0x4   :  { %435 = vmatprep.subr.msk.bf16.mxu0 %vm104_vm0, %v35_v3  ;;  %v127_v7 = vsel %vm104_vm0, %v35_v3, 0  ;;  %76 = vperm.xlu0 %445, %v22_v11   ;;  %v23_v13 = vld [vmem:[%s599_s2 + $0x38] sm:$0xff]  ;;  %v33_v15 = vpack.c.bf16 %v27_v10, %v26_v9  ;;  %v21_v16 = vld [vmem:[%s599_s2 + $0x28] sm:$0xff] }
   0x5   :  { %400 = vmatpush3.bf16.xpose.msra.mxu0 %v127_v7  ;;  %66 = vperm.xlu1 %446, %v20_v12   ;;  %v124_v14 = vsel %vm104_vm0, %v34_v6, 0 }
   0x6   :  { %436 = vmatprep.subr.msk.bf16.mxu0 %vm104_vm0, %v34_v6 }
   0x7   :  { %8 = vsyncpa [#allocation3], 0  ;;  %v18_v17 = vld [vmem:[%s599_s2 + $0x10] sm:$0xff]  ;;  %v19_v18 = vld [vmem:[%s599_s2 + $0x18] sm:$0xff]  ;;  %v121_v22 = vsel %vm104_vm0, %v33_v15, 0  ;;  %vm237_vm1 = vcmask 523264  }
   0x8   :  { %81 = vperm.xlu0 %445, %v23_v13   ;;  %v24_v19 = vld [vmem:[%s597_s0] sm:$0xff]  ;;  %v25_v20 = vld [vmem:[%s597_s0 + $0x8] sm:$0xff]  ;;  %v453_v27 = vld [vmem:[%s598_s1 + $0x10] sm:$0xff]   ;;  %v480_v30 = vmov 1   ;;  %v481_v4 = vmov 0.0   ;;  %vm482_vm2 = vmmov 0  }
   0x9   :  { %71 = vperm.xlu1 %446, %v21_v16   ;;  %v559_v21 = vld [vmem:[%s599_s2] sm:$0xff]  ;;  %v32_v23 = vpack.c.bf16 %v25_v20, %v24_v19  ;;  %v17_v24 = vld [vmem:[%s599_s2 + $0x8] sm:$0xff]  ;;  %v454_v28 = vld [vmem:[%s598_s1 + $0x18] sm:$0xff]   ;;  %v483_v5 = vmov 2   ;;  %s484_s29 = smov [#allocation2]   ;;  %vm348_vm3 = vcmask 516096  }
   0xa   :  { %v452_v26 = vld [vmem:[%s598_s1 + $0x8] sm:$0xff]   ;;  %v455_v29 = vld [vmem:[%s598_s1 + $0x20] sm:$0xff]   ;;  %s356_s30 = sshll.u32 %s484_s29, 4  ;;  %s357_s30 = int_to_ptr.vmem [resolvable:$true] %s356_s30 }
   0xb   :  { %v118_v25 = vsel %vm104_vm0, %v32_v23, 0  ;;  %423 = vmatprep.mubr.msk.bf16.mxu1 %vm237_vm1, %v455_v29  ;;  %v456_v3 = vld [vmem:[%s598_s1 + $0x28] sm:$0xff]   ;;  %s457_s4 = scalar_lea.vmem %s357_s30, 16  ;;  %s461_s5 = scalar_lea.vmem %s357_s30, 32 }
   0xc   :  { %56 = vperm.xlu0 %445, %v18_v17   ;;  %p458_p0 = scmp.ne.s32.totalorder %s357_s30, %s457_s4  ;;  %p462_p1 = scmp.lt.s32.totalorder %s357_s30, %s357_s30 }
   0xd   :  { %402 = vmatpush3.bf16.xpose.msra.mxu0 %v124_v14  ;;  %61 = vperm.xlu1 %446, %v19_v18   ;;  %p463_p2 = scmp.lt.s32.totalorder %s461_s5, %s457_s4 }
   0xe   :  { %437 = vmatprep.subr.msk.bf16.mxu0 %vm104_vm0, %v33_v15 }
   0xf   :  { %p464_p3 = por %p463_p2, %p462_p1 }
  0x10   :  { %46 = vperm.xlu0 %445, %v559_v21  }
  0x11   :  { %51 = vperm.xlu1 %446, %v17_v24   ;;  %p465_p4 = pnand %p464_p3, %p458_p0 }
  0x14   :  { %447 = vset.pattern.permute.xlu0 %v480_v30 }
  0x15   :  { %404 = vmatpush3.bf16.xpose.msra.mxu0 %v121_v22  ;;  %448 = vset.pattern.permute.xlu1 %v480_v30 }
  0x16   :  { %438 = vmatprep.subr.msk.bf16.mxu0 %vm104_vm0, %v32_v23  ;;  %224 = vperm.xlu1 %448, %v19_v18  }
  0x17   :  { %220 = vperm.xlu0 %447, %v18_v17  }
  0x1a   :  { %212 = vperm.xlu1 %448, %v559_v21  }
  0x1b   :  { %216 = vperm.xlu0 %447, %v17_v24   ;;  %v380_v24 = vld [vmem:[%s598_s1 + $0x40] sm:$0xf] }
  0x1d   :  { %406 = vmatpush3.bf16.xpose.msra.mxu0 %v118_v25 }
  0x1e   :  { %449 = vset.pattern.permute.xlu1 %v483_v5 }
  0x1f   :  { %450 = vset.pattern.permute.xlu0 %v483_v5  ;;  %302 = vperm.xlu1 %449, %v559_v21  }
  0x24   :  { %408 = vmatmul.mubr.msk.bf16.vlgmr.msra.gmra.mxu0 %vm104_vm0, %v452_v26 }
  0x25   :  { %411 = vmatprep.mubr.msk.bf16.mxu0 %vm104_vm0, %v453_v27 }
  0x2c   :  { %412 = vmatmul.mubr.msk.bf16.gmra.mxu0 %vm104_vm0, %v454_v28 }
  0x7f   :  { %v77_v32 = vpop.permute.xlu0 %76 }
  0x80   :  { %v67_v31 = vpop.permute.xlu1 %66 }
  0x83   :  { %v82_v37 = vpop.permute.xlu0 %81 }
  0x84   :  { %v72_v35 = vpop.permute.xlu1 %71 }
  0x87   :  { %v57_v43 = vpop.permute.xlu0 %56 }
  0x88   :  { %v62_v40 = vpop.permute.xlu1 %61 }
  0x8b   :  { %v47_v57 = vpop.permute.xlu0 %46 }
  0x8c   :  { %v52_v52 = vpop.permute.xlu1 %51 }
  0x91   :  { %v225_v6 = vpop.permute.xlu1 %224 }
  0x92   :  { %v221_v8 = vpop.permute.xlu0 %220 }
  0x95   :  { %v213_v11 = vpop.permute.xlu1 %212 }
  0x96   :  { %v217_v14 = vpop.permute.xlu0 %216 }
  0x9a   :  { %v303_v25 = vpop.permute.xlu1 %302 }
  0xe4   :  { %v409_v33 = vpop.f32.mrf.mxu0 }
  0xe5   :  { %v172_v53 = vadd.f32 %v409_v33, %v57_v43 }
  0xe6   :  { %v163_v34 = vpop.f32.mrf.mxu0 }
  0xe7   :  { %v196_v61 = vmax.f32 %v172_v53, 0.0  ;;  %v164_v62 = vadd.f32 %v163_v34, %v47_v57 }
  0xe8   :  { %v410_v36 = vpop.f32.mrf.mxu0 }
  0xe9   :  { %v175_v48 = vadd.f32 %v410_v36, %v62_v40  ;;  %v194_v1 = vmax.f32 %v164_v62, 0.0 }
  0xea   :  { %v166_v38 = vpop.f32.mrf.mxu0 }
  0xeb   :  { %v197_v58 = vmax.f32 %v175_v48, 0.0  ;;  %v167_v59 = vadd.f32 %v166_v38, %v52_v52 }
  0xec   :  { %v413_v39 = vpop.f32.mrf.mxu0 }
  0xed   :  { %v188_v42 = vadd.f32 %v413_v39, %v77_v32  ;;  %v203_v63 = vpack.c.bf16 %v197_v58, %v196_v61  ;;  %v195_v0 = vmax.f32 %v167_v59, 0.0 }
  0xee   :  { %v179_v41 = vpop.f32.mrf.mxu0 }
  0xef   :  { %v180_v45 = vadd.f32 %v179_v41, %v67_v31  ;;  %v200_v49 = vmax.f32 %v188_v42, 0.0  ;;  %v202_v2 = vpack.c.bf16 %v195_v0, %v194_v1 }
  0xf0   :  { %v414_v44 = vpop.f32.mrf.mxu0 }
  0xf1   :  { %v191_v46 = vadd.f32 %v414_v44, %v82_v37  ;;  %v198_v54 = vmax.f32 %v180_v45, 0.0 }
  0xf2   :  { %v182_v47 = vpop.f32.mrf.mxu0 }
  0xf3   :  { %v201_v50 = vmax.f32 %v191_v46, 0.0  ;;  %v183_v51 = vadd.f32 %v182_v47, %v72_v35 }
  0xf5   :  { %v199_v55 = vmax.f32 %v183_v51, 0.0  ;;  %v205_v56 = vpack.c.bf16 %v201_v50, %v200_v49 }
  0xf7   :  { %v204_v60 = vpack.c.bf16 %v199_v55, %v198_v54  ;;  %415 = vmatprep.subr.bf16.mxu1 %v205_v56 }
  0xf8   :  { %416 = vmatpush3.bf16.msra.mxu1 %v205_v56 }
  0xf9   :  { %417 = vmatprep.subr.bf16.mxu1 %v204_v60 }
  0xfc   :  { %418 = vmatpush3.bf16.msra.mxu1 %v204_v60 }
  0xfd   :  { %419 = vmatprep.subr.bf16.mxu1 %v203_v63 }
 0x100   :  { %420 = vmatpush3.bf16.msra.mxu1 %v203_v63 }
 0x101   :  { %421 = vmatprep.subr.bf16.mxu1 %v202_v2 }
 0x104   :  { %422 = vmatpush3.bf16.msra.mxu1 %v202_v2 }
 0x105   :  { %427 = vmatprep.subr.bf16.mxu1 %v481_v4 }
 0x107   :  { %424 = vmatmul.mubr.msk.bf16.vlgmr.msra.gmra.mxu1 %vm237_vm1, %v456_v3 }
 0x108   :  { %431 = vmatprep.mubr.msk.bf16.mxu1 %vm482_vm2, %v481_v4 }
 0x1c7   :  { %v425_v7 = vpop.f32.mrf.mxu1 }
 0x1c8   :  { %v287_v10 = vadd.f32 %v425_v7, %v221_v8 }
 0x1c9   :  { %v278_v9 = vpop.f32.mrf.mxu1 }
 0x1ca   :  { %v295_v16 = vmax.f32 %v287_v10, 0.0  ;;  %v279_v17 = vadd.f32 %v278_v9, %v213_v11 }
 0x1cb   :  { %v426_v12 = vpop.f32.mrf.mxu1 }
 0x1cc   :  { %v290_v13 = vadd.f32 %v426_v12, %v225_v6  ;;  %v293_v23 = vmax.f32 %v279_v17, 0.0 }
 0x1cd   :  { %v281_v15 = vpop.f32.mrf.mxu1 }
 0x1ce   :  { %v296_v18 = vmax.f32 %v290_v13, 0.0  ;;  %v282_v19 = vadd.f32 %v281_v15, %v217_v14 }
 0x1d0   :  { %v298_v20 = vpack.c.bf16 %v296_v18, %v295_v16  ;;  %v294_v22 = vmax.f32 %v282_v19, 0.0 }
 0x1d2   :  { %428 = vmatpush3.bf16.msra.mxu1 %v298_v20  ;;  %v297_v21 = vpack.c.bf16 %v294_v22, %v293_v23 }
 0x1d3   :  { %429 = vmatprep.subr.bf16.mxu1 %v481_v4 }
 0x1d6   :  { %430 = vmatpush3.bf16.msra.mxu1 %v297_v21 }
 0x1d9   :  { %432 = vmatmul.mubr.msk.bf16.vlgmr.msra.gmra.mxu1 %vm104_vm0, %v380_v24 }
 0x299   :  { %v342_v26 = vpop.f32.mrf.mxu1 }
 0x29a   :  { %v343_v27 = vadd.f32 %v342_v26, %v303_v25 }
 0x29b   :  { %v433_v28 = vpop.f32.mrf.mxu1 }
 0x29c   :  { %349 = vst.msk [vmem:[#allocation2] sm:$0x1] %vm348_vm3, %v343_v27 }
 0x29d   :  { %v345_v29 = vpop.f32.mrf.mxu1 }
 0x29e   :  { %468 = shalt.err (!%p465_p4)
}
 0x29f   :  { %359 = dma.vmem_to_hbm [thread:$0]  %s357_s30, 16, %s600_s3, [#allocation3]   ;;  %v434_v30 = vpop.f32.mrf.mxu1 }
 0x2a0   :  { %477 = dma.done.wait [#allocation3], 16  }
 0x2a1   :  { %478 = vsyncadd [#allocation3], 4294967280 }
 0x2a2   :  { %363 = vsyncpa [#allocation3], 1 }

</bundles_post_ra>
